<compile_context>
chip_gen: v7x
topology: tpu7x:2x2x1
jax: 0.10.0
libtpu: 0.0.40
codegen_flags: <defaults>
</compile_context>

<pallas_src>
import math
import functools

import jax
import jax.numpy as jnp
from jax import lax
from jax.experimental import pallas as pl
from jax.experimental.pallas import tpu as pltpu


def _fused_mha_kernel(q_ref, k_ref, v_ref, wq_ref, wk_ref, wv_ref, wo_ref,
                      o_ref, acc_ref, *, n_heads, scale):
    """One tile of TB reinterpreted batch rows per grid step.

    Block shapes: q/k/v/o are (TB, S, D); each weight is the full (H, K, D)
    per-head slab stack (resident across the grid, single-buffered).
    acc_ref is a (TB, S, D) f32 VMEM accumulator for the distributed output
    projection  sum_h ctx_h @ Wo_t[h*K:(h+1)*K, :].
    """
    tb, S, D = q_ref.shape
    K = D // n_heads
    R = tb * S
    cdt = q_ref.dtype                 # MXU operand dtype (bf16 or f32)

    acc_ref[...] = jnp.zeros_like(acc_ref)

    dn_lin = (((1,), (1,)), ((), ()))  # x @ W^T : nn.Linear (out,in) layout, no transpose
    dn_out = (((1,), (0,)), ((), ()))  # ctx_h @ Wo_t[head rows]

    @pl.loop(0, n_heads)
    def _head(h):
        # Re-load activations from VMEM per head (cheap vld) to bound live ranges.
        q2 = q_ref[...].reshape(R, D)
        k2 = k_ref[...].reshape(R, D)
        v2 = v_ref[...].reshape(R, D)
        wq_h = wq_ref[h]              # (K, D): rows h*K:(h+1)*K of (out,in) Wq
        wk_h = wk_ref[h]
        wv_h = wv_ref[h]
        wo_h = wo_ref[h]              # (K, D): rows h*K:(h+1)*K of Wo^T (in,out)

        # Per-head projections contract the full model dim on the MXU with f32
        # accumulation.  The 1/sqrt(k_dim) scale is folded into qp (S*K elems)
        # instead of the (S, S) score matrix.
        qp = lax.dot_general(q2, wq_h, dn_lin,
                             preferred_element_type=jnp.float32) * scale
        kp = lax.dot_general(k2, wk_h, dn_lin,
                             preferred_element_type=jnp.float32)
        vp = lax.dot_general(v2, wv_h, dn_lin,
                             preferred_element_type=jnp.float32)
        qp = qp.reshape(tb, S, K).astype(cdt)
        kp = kp.reshape(tb, S, K).astype(cdt)
        vp = vp.reshape(tb, S, K).astype(cdt)

        # Scores batched over the TB independent reinterpreted batch rows.
        s = jnp.einsum("bqk,bpk->bqp", qp, kp,
                       preferred_element_type=jnp.float32)          # (TB,S,S)
        m = jnp.max(s, axis=-1, keepdims=True)
        # TODO(synk): on v6e/v7x a bf16 exp roughly doubles EUP throughput when
        # K < 128 (EUP-bound regime); kept f32 here for accuracy.
        p = jnp.exp(s - m)
        denom = jnp.sum(p, axis=-1, keepdims=True)
        # TODO(synk): nn.Dropout(p_attn) has no inference-time effect; skipped.
        ctx = jnp.einsum("bqp,bpk->bqk", p.astype(cdt), vp,
                         preferred_element_type=jnp.float32)         # (TB,S,K)
        # Normalize AFTER the PV matmul: S*K multiplies instead of S*S.
        ctx = ctx * pl.reciprocal(denom, approx=False)
        out_h = lax.dot_general(ctx.reshape(R, K).astype(cdt), wo_h, dn_out,
                                preferred_element_type=jnp.float32)  # (R, D)
        acc_ref[...] += out_h.reshape(tb, S, D)

    o_ref[...] = acc_ref[...].astype(o_ref.dtype)


def _choose_block_rows(B, S):
    """Pick TB (reinterpreted batch rows per grid step).

    Fill the MXU M dim (target ~512 query rows per step) and amortize the
    ~0.35us/step pipeline overhead; prefer a grid length >= 2 (v7x has two
    TensorCores) only if each step still presents >= 128 rows.
    """
    divs = [d for d in range(1, B + 1) if B % d == 0]
    target = max(1, 512 // max(S, 1))
    tb = max([d for d in divs if d <= target] or [1])
    if B // tb < 2:
        alt = [d for d in divs if B // d >= 2 and d * S >= 128]
        if alt:
            tb = max(alt)
    return tb


def fused_mha(qb, kb, vb, wq_h3, wk_h3, wv_h3, wo_h3, n_heads, *,
              out_dtype, block_rows):
    """qb/kb/vb: (B, S, D); w*_h3: (H, K, D) per-head weight slabs -> (B, S, D)."""
    B, S, D = qb.shape
    K = D // n_heads
    tb = block_rows
    assert B % tb == 0

    kernel = functools.partial(_fused_mha_kernel, n_heads=n_heads,
                               scale=1.0 / math.sqrt(K))
    xspec = pl.BlockSpec((tb, S, D), lambda b: (b, 0, 0))
    ospec = pl.BlockSpec((tb, S, D), lambda b: (b, 0, 0))
    # Grid-invariant weights: constant index_map keeps them resident; Buffered(1)
    # avoids wasting VMEM on the second half of a pointless double buffer.
    wspec = pl.BlockSpec((n_heads, K, D), lambda b: (0, 0, 0),
                         pipeline_mode=pl.Buffered(1))

    itemsize = jnp.dtype(qb.dtype).itemsize
    est = (4 * D * D * itemsize                              # resident weights (x1)
           + 2 * 3 * tb * S * D * itemsize                   # double-buffered q/k/v
           + 2 * tb * S * D * jnp.dtype(out_dtype).itemsize  # double-buffered out
           + tb * S * D * 4                                  # f32 accumulator
           + 6 * tb * S * S * 4)                             # softmax temporaries
    vmem_limit = int(min(100 * 2**20, max(24 * 2**20, 2 * est)))

    cost = pl.CostEstimate(
        flops=8 * B * S * D * D + 4 * B * S * S * D,
        transcendentals=B * n_heads * S * S,
        bytes_accessed=itemsize * (4 * B * S * D + 4 * D * D),
    )
    # TODO(synk): for long sequences (S >= ~1024) the (TB, S, S) f32 score temp
    # must be replaced by a kv grid axis + online softmax (flash pattern), and
    # very large model_dim needs weight tiling — unnecessary at shapes where
    # everything fits comfortably in VMEM.
    return pl.pallas_call(
        kernel,
        out_shape=jax.ShapeDtypeStruct((B, S, D), out_dtype),
        grid=(B // tb,),
        in_specs=[xspec, xspec, xspec, wspec, wspec, wspec, wspec],
        out_specs=ospec,
        scratch_shapes=[pltpu.VMEM((tb, S, D), jnp.float32)],
        compiler_params=pltpu.CompilerParams(
            dimension_semantics=("parallel",),
            vmem_limit_bytes=vmem_limit),
        cost_estimate=cost,
    )(qb, kb, vb, wq_h3, wk_h3, wv_h3, wo_h3)


def init_mha_params(key, model_dim):
    """Deterministic nn.Linear-style init: U(-1/sqrt(in), 1/sqrt(in))."""
    bound = 1.0 / math.sqrt(model_dim)
    ks = jax.random.split(key, 4)
    shape = (model_dim, model_dim)  # (out_features, in_features)
    return {
        "wq": jax.random.uniform(ks[0], shape, jnp.float32, -bound, bound),
        "wk": jax.random.uniform(ks[1], shape, jnp.float32, -bound, bound),
        "wv": jax.random.uniform(ks[2], shape, jnp.float32, -bound, bound),
        "wo": jax.random.uniform(ks[3], shape, jnp.float32, -bound, bound),
    }


def mha_forward(q, k, v, params, n_heads, with_image=False,
                compute_dtype=jnp.bfloat16):
    """q, k, v: (tstep, bsize, model_dim) -> (tstep, bsize, model_dim).

    compute_dtype controls the MXU operand dtype (bf16 production default,
    f32 for bit-accurate validation); accumulation is always f32 and the
    output keeps the input dtype.
    """
    S, B, D = q.shape
    K = D // n_heads
    out_dtype = q.dtype
    # Raw row-major reinterpretation (free reshape, no HBM transpose pass):
    # matches PyTorch's `.view(batch, -1, n_heads, k_dim)` applied to the
    # (S, B, D)-contiguous tensor (this intentionally interleaves sequence and
    # batch positions, exactly like the reference module).
    qb = q.reshape(B, S, D).astype(compute_dtype)
    kb = k.reshape(B, S, D).astype(compute_dtype)
    vb = v.reshape(B, S, D).astype(compute_dtype)
    # nn.Linear (out, in) weights split per head along the OUT dim: a free
    # reshape, no transpose; the kernel contracts on their trailing (in) dim.
    wq_h3 = params["wq"].reshape(n_heads, K, D).astype(compute_dtype)
    wk_h3 = params["wk"].reshape(n_heads, K, D).astype(compute_dtype)
    wv_h3 = params["wv"].reshape(n_heads, K, D).astype(compute_dtype)
    # Output projection consumes per-head context slabs, so its IN dim must be
    # head-major: one D x D transpose per call (negligible vs the matmuls).
    wo_h3 = params["wo"].T.reshape(n_heads, K, D).astype(compute_dtype)

    tb = _choose_block_rows(B, S)
    x = fused_mha(qb, kb, vb, wq_h3, wk_h3, wv_h3, wo_h3, n_heads,
                  out_dtype=out_dtype, block_rows=tb)        # (B, S, D)
    # Reference's `.transpose(1, 2).contiguous().view(-1, B, D)` is, on the
    # (B, S, H, K)-contiguous context we produced, exactly this raw reshape.
    x = x.reshape(S, B, D)
    if with_image:
        return x[1:, :, :]
    return x


def mha_reference(q, k, v, params, n_heads):
    """Pure-jnp f32 reference mirroring the PyTorch forward (dropout = identity)."""
    S, B, D = q.shape
    K = D // n_heads
    qp = (q.reshape(S * B, D) @ params["wq"].T).reshape(B, S, n_heads, K)
    kp = (k.reshape(S * B, D) @ params["wk"].T).reshape(B, S, n_heads, K)
    vp = (v.reshape(S * B, D) @ params["wv"].T).reshape(B, S, n_heads, K)
    qp, kp, vp = (t.transpose(0, 2, 1, 3) for t in (qp, kp, vp))
    scores = jnp.einsum("bhqd,bhkd->bhqk", qp, kp) / math.sqrt(K)
    p = jax.nn.softmax(scores, axis=-1)
    x = jnp.einsum("bhqk,bhkd->bhqd", p, vp)
    x = x.transpose(0, 2, 1, 3).reshape(S, B, D)
    return (x.reshape(S * B, D) @ params["wo"].T).reshape(S, B, D)


if __name__ == "__main__":
    seq_len, batch_size, model_dim, n_heads = 8, 2, 32, 4

    root = jax.random.PRNGKey(0)
    kq, kk, kv, kp = jax.random.split(root, 4)
    q = jax.random.normal(kq, (seq_len, batch_size, model_dim), jnp.float32)
    k = jax.random.normal(kk, (seq_len, batch_size, model_dim), jnp.float32)
    v = jax.random.normal(kv, (seq_len, batch_size, model_dim), jnp.float32)
    params = init_mha_params(kp, model_dim)

    ref = mha_reference(q, k, v, params, n_heads)

    # f32-operand path: strict tolerance vs the f32 reference.
    out_f32 = jax.block_until_ready(
        mha_forward(q, k, v, params, n_heads, compute_dtype=jnp.float32))
    assert out_f32.shape == (seq_len, batch_size, model_dim)
    assert jnp.allclose(out_f32, ref, atol=1e-4, rtol=1e-4), "f32 mismatch"

    # bf16-operand / f32-accumulation path (production default): relaxed tol.
    out_bf16 = jax.block_until_ready(
        mha_forward(q, k, v, params, n_heads, compute_dtype=jnp.bfloat16))
    assert out_bf16.shape == (seq_len, batch_size, model_dim)
    assert jnp.allclose(out_bf16.astype(jnp.float32), ref,
                        atol=5e-2, rtol=5e-2), "bf16 mismatch"

    print("KERNEL_OK")
</pallas_src>

<mosaic_0001>
module attributes {stable_mosaic.version = 11 : i64} {
  func.func @_fused_mha_kernel(%arg0: i32, %arg1: memref<2x8x32xf32, #tpu.memory_space<vmem>>, %arg2: memref<2x8x32xf32, #tpu.memory_space<vmem>>, %arg3: memref<2x8x32xf32, #tpu.memory_space<vmem>>, %arg4: memref<4x8x32xf32, #tpu.memory_space<vmem>>, %arg5: memref<4x8x32xf32, #tpu.memory_space<vmem>>, %arg6: memref<4x8x32xf32, #tpu.memory_space<vmem>>, %arg7: memref<4x8x32xf32, #tpu.memory_space<vmem>>, %arg8: memref<2x8x32xf32, #tpu.memory_space<vmem>>, %arg9: memref<2x8x32xf32, #tpu.memory_space<vmem>>) attributes {dimension_semantics = [#tpu.dimension_semantics<parallel>], iteration_bounds = array<i64: 1>, scalar_prefetch = 0 : i64, scratch_operands = 1 : i64, tpu.core_type = #tpu.core_type<tc>, window_params = [{transform_indices = @transform_0, window_bounds = array<i64: 2, 8, 32>}, {transform_indices = @transform_1, window_bounds = array<i64: 2, 8, 32>}, {transform_indices = @transform_2, window_bounds = array<i64: 2, 8, 32>}, {pipeline_mode = #tpu.pipeline_mode<synchronous>, transform_indices = @transform_3, window_bounds = array<i64: 4, 8, 32>}, {pipeline_mode = #tpu.pipeline_mode<synchronous>, transform_indices = @transform_4, window_bounds = array<i64: 4, 8, 32>}, {pipeline_mode = #tpu.pipeline_mode<synchronous>, transform_indices = @transform_5, window_bounds = array<i64: 4, 8, 32>}, {pipeline_mode = #tpu.pipeline_mode<synchronous>, transform_indices = @transform_6, window_bounds = array<i64: 4, 8, 32>}, {transform_indices = @transform_7, window_bounds = array<i64: 2, 8, 32>}]} {
    %cst = arith.constant 0.000000e+00 : f32
    %0 = vector.broadcast %cst : f32 to vector<2x8x32xf32>
    %c0 = arith.constant 0 : index
    %c0_0 = arith.constant 0 : index
    %c0_1 = arith.constant 0 : index
    %1 = vector.load %arg9[%c0, %c0_0, %c0_1] : memref<2x8x32xf32, #tpu.memory_space<vmem>>, vector<2x8x32xf32>
    tpu.vector_store %arg9[%c0, %c0_0, %c0_1], %0 {strides = array<i32>} : memref<2x8x32xf32, #tpu.memory_space<vmem>>, vector<2x8x32xf32>,
    %c0_i32 = arith.constant 0 : i32
    %c4_i32 = arith.constant 4 : i32
    %2 = arith.addi %c0_i32, %c4_i32 : i32
    %c1_i32 = arith.constant 1 : i32
    scf.for %arg10 = %c0_i32 to %2 step %c1_i32  : i32 {
      %c1_i32_9 = arith.constant 1 : i32
      %5 = arith.muli %arg10, %c1_i32_9 : i32
      %c0_i32_10 = arith.constant 0 : i32
      %6 = arith.addi %c0_i32_10, %5 : i32
      %c0_11 = arith.constant 0 : index
      %c0_12 = arith.constant 0 : index
      %c0_13 = arith.constant 0 : index
      %7 = vector.load %arg1[%c0_11, %c0_12, %c0_13] : memref<2x8x32xf32, #tpu.memory_space<vmem>>, vector<2x8x32xf32>
      %8 = vector.shape_cast %7 : vector<2x8x32xf32> to vector<16x32xf32>
      %c0_14 = arith.constant 0 : index
      %c0_15 = arith.constant 0 : index
      %c0_16 = arith.constant 0 : index
      %9 = vector.load %arg2[%c0_14, %c0_15, %c0_16] : memref<2x8x32xf32, #tpu.memory_space<vmem>>, vector<2x8x32xf32>
      %10 = vector.shape_cast %9 : vector<2x8x32xf32> to vector<16x32xf32>
      %c0_17 = arith.constant 0 : index
      %c0_18 = arith.constant 0 : index
      %c0_19 = arith.constant 0 : index
      %11 = vector.load %arg3[%c0_17, %c0_18, %c0_19] : memref<2x8x32xf32, #tpu.memory_space<vmem>>, vector<2x8x32xf32>
      %12 = vector.shape_cast %11 : vector<2x8x32xf32> to vector<16x32xf32>
      %13 = arith.index_cast %6 : i32 to index
      %c0_20 = arith.constant 0 : index
      %c0_21 = arith.constant 0 : index
      %14 = vector.load %arg4[%13, %c0_20, %c0_21] : memref<4x8x32xf32, #tpu.memory_space<vmem>>, vector<1x8x32xf32>
      %15 = vector.shape_cast %14 : vector<1x8x32xf32> to vector<8x32xf32>
      %16 = arith.index_cast %6 : i32 to index
      %c0_22 = arith.constant 0 : index
      %c0_23 = arith.constant 0 : index
      %17 = vector.load %arg5[%16, %c0_22, %c0_23] : memref<4x8x32xf32, #tpu.memory_space<vmem>>, vector<1x8x32xf32>
      %18 = vector.shape_cast %17 : vector<1x8x32xf32> to vector<8x32xf32>
      %19 = arith.index_cast %6 : i32 to index
      %c0_24 = arith.constant 0 : index
      %c0_25 = arith.constant 0 : index
      %20 = vector.load %arg6[%19, %c0_24, %c0_25] : memref<4x8x32xf32, #tpu.memory_space<vmem>>, vector<1x8x32xf32>
      %21 = vector.shape_cast %20 : vector<1x8x32xf32> to vector<8x32xf32>
      %22 = arith.index_cast %6 : i32 to index
      %c0_26 = arith.constant 0 : index
      %c0_27 = arith.constant 0 : index
      %23 = vector.load %arg7[%22, %c0_26, %c0_27] : memref<4x8x32xf32, #tpu.memory_space<vmem>>, vector<1x8x32xf32>
      %24 = vector.shape_cast %23 : vector<1x8x32xf32> to vector<8x32xf32>
      %cst_28 = arith.constant dense<0.000000e+00> : vector<16x8xf32>
      %25 = tpu.matmul %8, %15, %cst_28 {dimension_numbers = #tpu.dot_dimension_numbers<[1], [1], [0], [0], [0, 0, 1, 0], [], []>} : vector<16x32xf32>, vector<8x32xf32>, vector<16x8xf32> -> vector<16x8xf32>
      %cst_29 = arith.constant 0.353553385 : f32
      %26 = vector.broadcast %cst_29 : f32 to vector<16x8xf32>
      %27 = arith.mulf %25, %26 : vector<16x8xf32>
      %cst_30 = arith.constant dense<0.000000e+00> : vector<16x8xf32>
      %28 = tpu.matmul %10, %18, %cst_30 {dimension_numbers = #tpu.dot_dimension_numbers<[1], [1], [0], [0], [0, 0, 1, 0], [], []>} : vector<16x32xf32>, vector<8x32xf32>, vector<16x8xf32> -> vector<16x8xf32>
      %cst_31 = arith.constant dense<0.000000e+00> : vector<16x8xf32>
      %29 = tpu.matmul %12, %21, %cst_31 {dimension_numbers = #tpu.dot_dimension_numbers<[1], [1], [0], [0], [0, 0, 1, 0], [], []>} : vector<16x32xf32>, vector<8x32xf32>, vector<16x8xf32> -> vector<16x8xf32>
      %30 = vector.shape_cast %27 : vector<16x8xf32> to vector<2x8x8xf32>
      %31 = vector.shape_cast %28 : vector<16x8xf32> to vector<2x8x8xf32>
      %32 = vector.shape_cast %29 : vector<16x8xf32> to vector<2x8x8xf32>
      "tpu.trace_start"() <{level = 10 : i32, message = "bqk,bpk->bqp"}> : () -> ()
      %cst_32 = arith.constant dense<0.000000e+00> : vector<2x8x8xf32>
      %33 = tpu.matmul %30, %31, %cst_32 {dimension_numbers = #tpu.dot_dimension_numbers<[2], [2], [1], [1], [0, 0, 0, 1, 1, 1], [0], [0]>} : vector<2x8x8xf32>, vector<2x8x8xf32>, vector<2x8x8xf32> -> vector<2x8x8xf32>
      "tpu.trace_stop"() : () -> ()
      %cst_33 = arith.constant dense<0xFF800000> : vector<2x8xf32>
      %34 = vector.multi_reduction <maximumf>, %33, %cst_33 [2] : vector<2x8x8xf32> to vector<2x8xf32>
      %35 = vector.shape_cast %34 : vector<2x8xf32> to vector<2x8x1xf32>
      %36 = vector.broadcast %35 : vector<2x8x1xf32> to vector<2x8x8xf32>
      %37 = arith.subf %33, %36 : vector<2x8x8xf32>
      %38 = math.exp %37 : vector<2x8x8xf32>
      %cst_34 = arith.constant dense<0.000000e+00> : vector<2x8xf32>
      %39 = vector.multi_reduction <add>, %38, %cst_34 [2] : vector<2x8x8xf32> to vector<2x8xf32>
      %40 = vector.shape_cast %39 : vector<2x8xf32> to vector<2x8x1xf32>
      "tpu.trace_start"() <{level = 10 : i32, message = "bqp,bpk->bqk"}> : () -> ()
      %cst_35 = arith.constant dense<0.000000e+00> : vector<2x8x8xf32>
      %41 = tpu.matmul %38, %32, %cst_35 {dimension_numbers = #tpu.dot_dimension_numbers<[2], [1], [1], [2], [0, 0, 0, 1, 1, 2], [0], [0]>} : vector<2x8x8xf32>, vector<2x8x8xf32>, vector<2x8x8xf32> -> vector<2x8x8xf32>
      "tpu.trace_stop"() : () -> ()
      %42 = tpu.reciprocal %40 : vector<2x8x1xf32> -> vector<2x8x1xf32>
      %43 = vector.broadcast %42 : vector<2x8x1xf32> to vector<2x8x8xf32>
      %44 = arith.mulf %41, %43 : vector<2x8x8xf32>
      %45 = vector.shape_cast %44 : vector<2x8x8xf32> to vector<16x8xf32>
      %cst_36 = arith.constant dense<0.000000e+00> : vector<16x32xf32>
      %46 = tpu.matmul %45, %24, %cst_36 {dimension_numbers = #tpu.dot_dimension_numbers<[1], [0], [0], [1], [0, 0, 1, 1], [], []>} : vector<16x8xf32>, vector<8x32xf32>, vector<16x32xf32> -> vector<16x32xf32>
      %c0_37 = arith.constant 0 : index
      %c0_38 = arith.constant 0 : index
      %c0_39 = arith.constant 0 : index
      %47 = vector.load %arg9[%c0_37, %c0_38, %c0_39] : memref<2x8x32xf32, #tpu.memory_space<vmem>>, vector<2x8x32xf32>
      %48 = vector.shape_cast %46 : vector<16x32xf32> to vector<2x8x32xf32>
      %49 = arith.addf %47, %48 : vector<2x8x32xf32>
      %c0_40 = arith.constant 0 : index
      %c0_41 = arith.constant 0 : index
      %c0_42 = arith.constant 0 : index
      %50 = vector.load %arg9[%c0_40, %c0_41, %c0_42] : memref<2x8x32xf32, #tpu.memory_space<vmem>>, vector<2x8x32xf32>
      tpu.vector_store %arg9[%c0_40, %c0_41, %c0_42], %49 {strides = array<i32>} : memref<2x8x32xf32, #tpu.memory_space<vmem>>, vector<2x8x32xf32>,
    }
    %c4_i32_2 = arith.constant 4 : i32
    %c0_3 = arith.constant 0 : index
    %c0_4 = arith.constant 0 : index
    %c0_5 = arith.constant 0 : index
    %3 = vector.load %arg9[%c0_3, %c0_4, %c0_5] : memref<2x8x32xf32, #tpu.memory_space<vmem>>, vector<2x8x32xf32>
    %c0_6 = arith.constant 0 : index
    %c0_7 = arith.constant 0 : index
    %c0_8 = arith.constant 0 : index
    %4 = vector.load %arg8[%c0_6, %c0_7, %c0_8] : memref<2x8x32xf32, #tpu.memory_space<vmem>>, vector<2x8x32xf32>
    tpu.vector_store %arg8[%c0_6, %c0_7, %c0_8], %3 {strides = array<i32>} : memref<2x8x32xf32, #tpu.memory_space<vmem>>, vector<2x8x32xf32>,
    return
  }
  func.func @transform_0(%arg0: i32) -> (i32, i32, i32) {
    %c0_i32 = arith.constant 0 : i32
    %c0_i32_0 = arith.constant 0 : i32
    %c0_i32_1 = arith.constant 0 : i32
    return %arg0, %c0_i32, %c0_i32_0 : i32, i32, i32
  }
  func.func @transform_1(%arg0: i32) -> (i32, i32, i32) {
    %c0_i32 = arith.constant 0 : i32
    %c0_i32_0 = arith.constant 0 : i32
    %c0_i32_1 = arith.constant 0 : i32
    return %arg0, %c0_i32, %c0_i32_0 : i32, i32, i32
  }
  func.func @transform_2(%arg0: i32) -> (i32, i32, i32) {
    %c0_i32 = arith.constant 0 : i32
    %c0_i32_0 = arith.constant 0 : i32
    %c0_i32_1 = arith.constant 0 : i32
    return %arg0, %c0_i32, %c0_i32_0 : i32, i32, i32
  }
  func.func @transform_3(%arg0: i32) -> (i32, i32, i32) {
    %c0_i32 = arith.constant 0 : i32
    %c0_i32_0 = arith.constant 0 : i32
    %c0_i32_1 = arith.constant 0 : i32
    %c0_i32_2 = arith.constant 0 : i32
    return %c0_i32, %c0_i32_0, %c0_i32_1 : i32, i32, i32
  }
  func.func @transform_4(%arg0: i32) -> (i32, i32, i32) {
    %c0_i32 = arith.constant 0 : i32
    %c0_i32_0 = arith.constant 0 : i32
    %c0_i32_1 = arith.constant 0 : i32
    %c0_i32_2 = arith.constant 0 : i32
    return %c0_i32, %c0_i32_0, %c0_i32_1 : i32, i32, i32
  }
  func.func @transform_5(%arg0: i32) -> (i32, i32, i32) {
    %c0_i32 = arith.constant 0 : i32
    %c0_i32_0 = arith.constant 0 : i32
    %c0_i32_1 = arith.constant 0 : i32
    %c0_i32_2 = arith.constant 0 : i32
    return %c0_i32, %c0_i32_0, %c0_i32_1 : i32, i32, i32
  }
  func.func @transform_6(%arg0: i32) -> (i32, i32, i32) {
    %c0_i32 = arith.constant 0 : i32
    %c0_i32_0 = arith.constant 0 : i32
    %c0_i32_1 = arith.constant 0 : i32
    %c0_i32_2 = arith.constant 0 : i32
    return %c0_i32, %c0_i32_0, %c0_i32_1 : i32, i32, i32
  }
  func.func @transform_7(%arg0: i32) -> (i32, i32, i32) {
    %c0_i32 = arith.constant 0 : i32
    %c0_i32_0 = arith.constant 0 : i32
    %c0_i32_1 = arith.constant 0 : i32
    return %arg0, %c0_i32, %c0_i32_0 : i32, i32, i32
  }
}

</mosaic_0001>

<bundles_post_ra>
// kernel: tpu_custom_call.1
= control target key start
LH: loop header
LB: loop body
LE: loop exit
PB: predicated region body
PF: predicated region fallthrough
CT: control target
= control target key end

     0   :  { %12 = vsyncpa [#allocation4], 0  ;;  %s1389_s0 = inlined_call_operand.hbm [shape: f32[2,8,32], index: 0, kind: input, shape index: {}]   ;;  %s1390_s1 = inlined_call_operand.hbm [shape: f32[2,8,32], index: 1, kind: input, shape index: {}]   ;;  %s1391_s2 = inlined_call_operand.hbm [shape: f32[2,8,32], index: 2, kind: input, shape index: {}]   ;;  %s1392_s3 = inlined_call_operand.hbm [shape: f32[4,8,32], index: 3, kind: input, shape index: {}]   ;;  %s1393_s4 = inlined_call_operand.hbm [shape: f32[4,8,32], index: 4, kind: input, shape index: {}]   ;;  %s1394_s5 = inlined_call_operand.hbm [shape: f32[4,8,32], index: 5, kind: input, shape index: {}]   ;;  %s1395_s6 = inlined_call_operand.hbm [shape: f32[4,8,32], index: 6, kind: input, shape index: {}]   ;;  %s1396_s7 = inlined_call_operand.hbm [shape: f32[2,8,32], index: 7, kind: output, shape index: {}]  }
   0x1   :  { %13 = vsyncpa [#allocation7], 0 }
   0x2   :  { %14 = vsyncpa [#allocation10], 0 }
   0x3   :  { %15 = vsyncpa [#allocation13], 0 }
   0x4   :  { %16 = vsyncpa [#allocation5], 0  ;;  %s1146_s24 = smov [#allocation6]   ;;  %s1147_s26 = smov [#allocation9]  }
   0x5   :  { %s34_s25 = sshll.u32 %s1146_s24, 4  ;;  %s58_s27 = sshll.u32 %s1147_s26, 4  ;;  %s35_s25 = int_to_ptr.vmem [resolvable:$true] %s34_s25  ;;  %s1199_s27 = int_to_ptr.vmem [resolvable:$true] %s58_s27 }
   0x6   :  { %s952_s30 = scalar_lea.hbm %s1390_s1, 256 }
   0x7   :  { %p953_p0 = scmp.ne.s32.totalorder %s1390_s1, %s952_s30  ;;  %p956_p1 = scmp.lt.u32.totalorder %s952_s30, %s1390_s1 }
   0x9   :  { %p958_p2 = pnand %p956_p1, %p953_p0 }
   0xb   :  { %961 = shalt.err (!%p958_p2)
}
   0xc   :  { %s962_s12 = scalar_lea.vmem %s35_s25, 256  ;;  %p967_p4 = scmp.lt.s32.totalorder %s35_s25, %s35_s25 }
   0xd   :  { %p963_p3 = scmp.ne.s32.totalorder %s35_s25, %s962_s12  ;;  %p968_p5 = scmp.lt.s32.totalorder %s962_s12, %s962_s12 }
   0xf   :  { %p969_p6 = por %p968_p5, %p967_p4 }
  0x11   :  { %p970_p7 = pnand %p969_p6, %p963_p3 }
  0x13   :  { %973 = shalt.err (!%p970_p7)
}
  0x14   :  { %s1148_s13 = smov 128   ;;  %s1149_s14 = smov 8  }
  0x15   :  { %40 = dma.hbm_to_vmem [thread:$0]  %s1390_s1, 256, %s35_s25, [#allocation7], %s1148_s13, %s1148_s13, %s1149_s14  }
  0x16   :  { %s974_s19 = scalar_lea.hbm %s1392_s3, 512 }
  0x17   :  { %p975_p8 = scmp.ne.s32.totalorder %s1392_s3, %s974_s19  ;;  %p978_p9 = scmp.lt.u32.totalorder %s974_s19, %s1392_s3 }
  0x19   :  { %p980_p10 = pnand %p978_p9, %p975_p8 }
  0x1b   :  { %983 = shalt.err (!%p980_p10)
}
  0x1c   :  { %s984_s24 = scalar_lea.vmem %s1199_s27, 512  ;;  %p989_p12 = scmp.lt.s32.totalorder %s1199_s27, %s1199_s27 }
  0x1d   :  { %p985_p11 = scmp.ne.s32.totalorder %s1199_s27, %s984_s24  ;;  %p990_p13 = scmp.lt.s32.totalorder %s984_s24, %s984_s24 }
  0x1f   :  { %p991_p0 = por %p990_p13, %p989_p12 }
  0x21   :  { %p992_p1 = pnand %p991_p0, %p985_p11 }
  0x23   :  { %995 = shalt.err (!%p992_p1)
}
  0x24   :  { %64 = dma.hbm_to_vmem [thread:$0]  %s1392_s3, 512, %s1199_s27, [#allocation10], %s1148_s13, %s1148_s13, %s1149_s14  }
  0x25   :  { %s1150_s26 = smov [#allocation12]   ;;  %s1151_s29 = smov [#allocation3]  }
  0x26   :  { %s82_s28 = sshll.u32 %s1150_s26, 4  ;;  %s22_s30 = sshll.u32 %s1151_s29, 4  ;;  %s83_s28 = int_to_ptr.vmem [resolvable:$true] %s82_s28  ;;  %s1236_s30 = int_to_ptr.vmem [resolvable:$true] %s22_s30 }
  0x27   :  { %s996_s10 = scalar_lea.hbm %s1394_s5, 512 }
  0x28   :  { %p997_p2 = scmp.ne.s32.totalorder %s1394_s5, %s996_s10  ;;  %p1000_p3 = scmp.lt.u32.totalorder %s996_s10, %s1394_s5 }
  0x2a   :  { %p1002_p4 = pnand %p1000_p3, %p997_p2 }
  0x2c   :  { %1005 = shalt.err (!%p1002_p4)
}
  0x2d   :  { %s1006_s3 = scalar_lea.vmem %s83_s28, 512  ;;  %p1011_p6 = scmp.lt.s32.totalorder %s83_s28, %s83_s28 }
  0x2e   :  { %p1007_p5 = scmp.ne.s32.totalorder %s83_s28, %s1006_s3  ;;  %p1012_p7 = scmp.lt.s32.totalorder %s1006_s3, %s1006_s3 }
  0x30   :  { %p1013_p8 = por %p1012_p7, %p1011_p6 }
  0x32   :  { %p1014_p9 = pnand %p1013_p8, %p1007_p5 }
  0x34   :  { %1017 = shalt.err (!%p1014_p9)
}
  0x35   :  { %88 = dma.hbm_to_vmem [thread:$0]  %s1394_s5, 512, %s83_s28, [#allocation13], %s1148_s13, %s1148_s13, %s1149_s14  }
  0x36   :  { %s1018_s20 = scalar_lea.hbm %s1389_s0, 256 }
  0x37   :  { %p1019_p10 = scmp.ne.s32.totalorder %s1389_s0, %s1018_s20  ;;  %p1022_p11 = scmp.lt.u32.totalorder %s1018_s20, %s1389_s0 }
  0x39   :  { %p1024_p12 = pnand %p1022_p11, %p1019_p10 }
  0x3b   :  { %1027 = shalt.err (!%p1024_p12)
}
  0x3c   :  { %s1028_s1 = scalar_lea.vmem %s1236_s30, 256  ;;  %p1033_p0 = scmp.lt.s32.totalorder %s1236_s30, %s1236_s30 }
  0x3d   :  { %p1029_p13 = scmp.ne.s32.totalorder %s1236_s30, %s1028_s1  ;;  %p1034_p1 = scmp.lt.s32.totalorder %s1028_s1, %s1028_s1 }
  0x3f   :  { %p1035_p2 = por %p1034_p1, %p1033_p0 }
  0x41   :  { %p1036_p3 = pnand %p1035_p2, %p1029_p13 }
  0x43   :  { %1039 = shalt.err (!%p1036_p3)
}
  0x44   :  { %28 = dma.hbm_to_vmem [thread:$0]  %s1389_s0, 256, %s1236_s30, [#allocation4], %s1148_s13, %s1148_s13, %s1149_s14  }
  0x45   :  { %s1152_s26 = smov [#allocation8]   ;;  %s1153_s29 = smov [#allocation11]  }
  0x46   :  { %s46_s28 = sshll.u32 %s1152_s26, 4  ;;  %s70_s8 = sshll.u32 %s1153_s29, 4  ;;  %s47_s28 = int_to_ptr.vmem [resolvable:$true] %s46_s28  ;;  %s1273_s8 = int_to_ptr.vmem [resolvable:$true] %s70_s8 }
  0x47   :  { %s1040_s11 = scalar_lea.hbm %s1391_s2, 256 }
  0x48   :  { %p1041_p4 = scmp.ne.s32.totalorder %s1391_s2, %s1040_s11  ;;  %p1044_p5 = scmp.lt.u32.totalorder %s1040_s11, %s1391_s2 }
  0x4a   :  { %p1046_p6 = pnand %p1044_p5, %p1041_p4 }
  0x4c   :  { %1049 = shalt.err (!%p1046_p6)
}
  0x4d   :  { %s1050_s0 = scalar_lea.vmem %s47_s28, 256  ;;  %p1055_p8 = scmp.lt.s32.totalorder %s47_s28, %s47_s28 }
  0x4e   :  { %p1051_p7 = scmp.ne.s32.totalorder %s47_s28, %s1050_s0  ;;  %p1056_p9 = scmp.lt.s32.totalorder %s1050_s0, %s1050_s0 }
  0x50   :  { %p1057_p10 = por %p1056_p9, %p1055_p8 }
  0x52   :  { %p1058_p11 = pnand %p1057_p10, %p1051_p7 }
  0x54   :  { %1061 = shalt.err (!%p1058_p11)
}
  0x55   :  { %52 = dma.hbm_to_vmem [thread:$0]  %s1391_s2, 256, %s47_s28, [#allocation7], %s1148_s13, %s1148_s13, %s1149_s14  }
  0x56   :  { %s1062_s19 = scalar_lea.hbm %s1393_s4, 512 }
  0x57   :  { %p1063_p12 = scmp.ne.s32.totalorder %s1393_s4, %s1062_s19  ;;  %p1066_p13 = scmp.lt.u32.totalorder %s1062_s19, %s1393_s4 }
  0x59   :  { %p1068_p0 = pnand %p1066_p13, %p1063_p12 }
  0x5b   :  { %1071 = shalt.err (!%p1068_p0)
}
  0x5c   :  { %s1072_s24 = scalar_lea.vmem %s1273_s8, 512  ;;  %p1077_p2 = scmp.lt.s32.totalorder %s1273_s8, %s1273_s8 }
  0x5d   :  { %p1073_p1 = scmp.ne.s32.totalorder %s1273_s8, %s1072_s24  ;;  %p1078_p3 = scmp.lt.s32.totalorder %s1072_s24, %s1072_s24 }
  0x5f   :  { %p1079_p4 = por %p1078_p3, %p1077_p2 }
  0x61   :  { %p1080_p5 = pnand %p1079_p4, %p1073_p1 }
  0x63   :  { %1083 = shalt.err (!%p1080_p5)
}
  0x64   :  { %76 = dma.hbm_to_vmem [thread:$0]  %s1393_s4, 512, %s1273_s8, [#allocation10], %s1148_s13, %s1148_s13, %s1149_s14  }
  0x65   :  { %s1154_s5 = smov [#allocation14]   ;;  %s1084_s29 = scalar_lea.hbm %s1395_s6, 512 }
  0x66   :  { %s94_s25 = sshll.u32 %s1154_s5, 4  ;;  %p1085_p6 = scmp.ne.s32.totalorder %s1395_s6, %s1084_s29  ;;  %s95_s25 = int_to_ptr.vmem [resolvable:$true] %s94_s25 }
  0x67   :  { %p1088_p7 = scmp.lt.u32.totalorder %s1084_s29, %s1395_s6 }
  0x69   :  { %p1090_p8 = pnand %p1088_p7, %p1085_p6 }
  0x6b   :  { %1093 = shalt.err (!%p1090_p8)
}
  0x6c   :  { %s1094_s15 = scalar_lea.vmem %s95_s25, 512  ;;  %p1099_p10 = scmp.lt.s32.totalorder %s95_s25, %s95_s25 }
  0x6d   :  { %p1095_p9 = scmp.ne.s32.totalorder %s95_s25, %s1094_s15  ;;  %p1100_p11 = scmp.lt.s32.totalorder %s1094_s15, %s1094_s15 }
  0x6f   :  { %p1101_p12 = por %p1100_p11, %p1099_p10 }
  0x71   :  { %p1102_p13 = pnand %p1101_p12, %p1095_p9 }
  0x73   :  { %1105 = shalt.err (!%p1102_p13)
}
  0x74   :  { %100 = dma.hbm_to_vmem [thread:$0]  %s1395_s6, 512, %s95_s25, [#allocation13], %s1148_s13, %s1148_s13, %s1149_s14  }
  0x75   :  { %1132 = dma.done.wait [#allocation4], 256  }
  0x76   :  { %1133 = vsyncadd [#allocation4], 4294967040 }
  0x77   :  { %1134 = dma.done.wait [#allocation7], 512  }
  0x78   :  { %1135 = vsyncadd [#allocation7], 4294966784 }
  0x79   :  { %1136 = dma.done.wait [#allocation10], 1024  }
  0x7a   :  { %1137 = vsyncadd [#allocation10], 4294966272 }
  0x7b   :  { %1138 = dma.done.wait [#allocation13], 1024  }
  0x7c   :  { %1139 = vsyncadd [#allocation13], 4294966272  ;;  %vm122_vm0 = vcmask 261120   ;;  %v1155_v0 = vmov 0.0   ;;  %s1327_s16 = smov 0  }
  0x7d   :  { %123 = vst.msk [vmem:[#allocation2] sm:$0xff] %vm122_vm0, %v1155_v0  ;;  %124 = vst.msk [vmem:[#allocation2 + $0x8] sm:$0xff] %vm122_vm0, %v1155_v0 }
  0x7e LB: > { %v133_v1 = vld [vmem:[#allocation6] sm:$0xff]  ;;  %v131_v2 = vld [vmem:[#allocation3] sm:$0xff]  ;;  %s1335_s6 = sshll.u32 %s1144_s16, 3  ;;  %v134_v6 = vld [vmem:[#allocation6 + $0x8] sm:$0xff]  ;;  %v1156_v10 = vmov 0.0   ;;  %vm1157_vm1 = vmmov 0   ;;  %s1144_s16 = sphi %s1327_s16, %s130_s16  }
  0x7f   : > { %890 = vmatprep.mubr.msk.f32.mxu1 %vm122_vm0, %v133_v1  ;;  %885 = vmatprep.mubr.msk.f32.mxu0 %vm122_vm0, %v131_v2  ;;  %s140_s3 = scalar_lea.vmem [#allocation11], %s1335_s6  ;;  %s138_s0 = scalar_lea.vmem [#allocation9], %s1335_s6  ;;  %v132_v7 = vld [vmem:[#allocation3 + $0x8] sm:$0xff]  ;;  %v135_v8 = vld [vmem:[#allocation8] sm:$0xff]  ;;  %vm400_vm2 = vcmask 64512  }
  0x80   : > { %v141_v3 = vld [vmem:[%s140_s3] sm:$0xff]  ;;  %s142_s30 = scalar_lea.vmem [#allocation12], %s1335_s6  ;;  %v136_v9 = vld [vmem:[#allocation8 + $0x8] sm:$0xff]  ;;  %s144_s27 = scalar_lea.vmem [#allocation14], %s1335_s6 }
  0x81   : > { %v139_v4 = vld [vmem:[%s138_s0] sm:$0xff]  ;;  %888 = vmatprep.subr.msk.mxu1 %vm122_vm0, %v141_v3  ;;  %s130_s16 = sadd.s32 1, %s1144_s16  }
  0x82   : > { %883 = vmatprep.subr.msk.mxu0 %vm122_vm0, %v139_v4  ;;  %v143_v5 = vld [vmem:[%s142_s30] sm:$0xff]  ;;  %889 = vmatpush3.xpose.msk.msra.mxu1 %vm122_vm0, %v141_v3  ;;  %p127_p0 = scmp.ge.s32.totalorder %s130_s16, 4  }
  0x83   : > { %884 = vmatpush3.xpose.msk.msra.mxu0 %vm122_vm0, %v139_v4  ;;  %898 = vmatprep.subr.mxu1 %v1156_v10  ;;  %v145_v35 = vld [vmem:[%s144_s27] sm:$0xff]  ;;  %s1158_s17 = smov (%p127_p0), [#allocation15]  }
  0x84   : > { %893 = vmatprep.subr.msk.mxu0 %vm122_vm0, %v143_v5  ;;  %v803_v46 = vld [vmem:[#allocation2 + $0x8] sm:$0xff]  ;;  %v802_v47 = vld [vmem:[#allocation2] sm:$0xff]  ;;  %s817_s18 = sshll.u32 (%p127_p0), %s1158_s17, 4  ;;  %s818_s18 = int_to_ptr.vmem [resolvable:$true] %s817_s18 }
  0x85   : > { %891 = vmatmul.mubr.msk.f32.vlgmr.msra.gmra.mrb[0].mxu1 %vm122_vm0, %v134_v6  ;;  %s1106_s19 = scalar_lea.vmem (%p127_p0), %s818_s18, 256  ;;  %p1111_p2 = scmp.lt.s32.totalorder (%p127_p0), %s818_s18, %s818_s18 }
  0x86   : > { %886 = vmatmul.mubr.msk.f32.vlgmr.msra.gmra.mrb[0].mxu0 %vm122_vm0, %v132_v7  ;;  %900 = vmatprep.mubr.msk.f32.mxu1 %vm1157_vm1, %v1156_v10  ;;  %p1107_p1 = scmp.ne.s32.totalorder (%p127_p0), %s818_s18, %s1106_s19  ;;  %p1112_p3 = scmp.lt.s32.totalorder (%p127_p0), %s1106_s19, %s1106_s19 }
  0x87   : > { %894 = vmatpush3.xpose.msk.msra.mxu0 %vm122_vm0, %v143_v5  ;;  %895 = vmatprep.mubr.msk.f32.mxu0 %vm122_vm0, %v135_v8 }
  0x88   : > { %903 = vmatprep.subr.mxu0 %v1156_v10  ;;  %p1113_p4 = por (%p127_p0), %p1112_p3, %p1111_p2 }
  0x8a   : > { %896 = vmatmul.mubr.msk.f32.vlgmr.msra.gmra.mrb[2].mxu0 %vm122_vm0, %v136_v9  ;;  %p1114_p5 = pnand (%p127_p0), %p1113_p4, %p1107_p1 }
  0x8b   : > { %905 = vmatprep.mubr.msk.f32.mxu0 %vm1157_vm1, %v1156_v10 }
 0x158   : > { %v892_v11 = vpop.f32.mrb[0].mxu1 }
 0x159   : > { %v887_v12 = vpop.f32.mrb[0].mxu0  ;;  %v307_v14 = vpop.f32.mrb[1].mxu1  ;;  %904 = vmatpush3.xpose.msk.msra.mxu0 %vm400_vm2, %v892_v11 }
 0x15a   : > { %v231_v13 = vmul.f32 0.35355338, %v887_v12  ;;  %v221_v15 = vpop.f32.mrb[1].mxu0  ;;  %899 = vmatpush3.xpose.msk.msra.mxu1 %vm400_vm2, %v307_v14  ;;  %913 = vmatprep.subr.mxu0 %v1156_v10 }
 0x15b   : > { %v230_v16 = vmul.f32 0.35355338, %v221_v15  ;;  %908 = vmatprep.subr.mxu1 %v1156_v10 }
 0x15c   : > { %906 = vmatmul.mubr.msk.f32.vlgmr.msra.gmra.mrb[4].mxu0 %vm400_vm2, %v231_v13 }
 0x15d   : > { %901 = vmatmul.mubr.msk.f32.vlgmr.msra.gmra.mrb[2].mxu1 %vm400_vm2, %v230_v16  ;;  %915 = vmatprep.mubr.msk.f32.mxu0 %vm1157_vm1, %v1156_v10  ;;  %v897_v17 = vpop.f32.mrb[2].mxu0 }
 0x15e   : > { %910 = vmatprep.mubr.msk.f32.mxu1 %vm1157_vm1, %v1156_v10  ;;  %v391_v18 = vpop.f32.mrb[3].mxu0  ;;  %914 = vmatpush3.msra.mxu0 %v897_v17 }
 0x15f   : > { %909 = vmatpush3.msra.mxu1 %v391_v18 }
 0x160   : > { %918 = vmatprep.subr.mxu1 %v145_v35 }
 0x22f   : > { %v549_v19 = vpop.f32.mrb[4].mxu0 }
 0x230   : > { %v473_v20 = vpop.f32.mrb[2].mxu1  ;;  %v907_v21 = vpop.f32.mrb[5].mxu0  ;;  %v556_v24 = vsel %vm400_vm2, %v549_v19, -inf }
 0x231   : > { %v902_v22 = vpop.f32.mrb[3].mxu1  ;;  %v553_v23 = vsel %vm400_vm2, %v473_v20, -inf }
 0x232   : > { %554 = vmax.xlane.f32.xlu0 %v553_v23 }
 0x236   : > { %557 = vmax.xlane.f32.xlu0 %v556_v24 }
 0x2bf   : > { %v555_v25 = vpop.xlane.xlu0 %554 }
 0x2c0   : > { %v559_v26 = vsub.f32 %v473_v20, %v555_v25 }
 0x2c2   : > { %v561_v27 = vmul.f32 1.442695, %v559_v26 }
 0x2c3   : > { %v558_v28 = vpop.xlane.xlu0 %557 }
 0x2c4   : > { %944 = vpow2.f32 %v561_v27  ;;  %v560_v29 = vsub.f32 %v549_v19, %v558_v28 }
 0x2c6   : > { %v563_v30 = vmul.f32 1.442695, %v560_v29 }
 0x2c8   : > { %946 = vpow2.f32 %v563_v30 }
 0x2ce   : > { %v945_v31 = vpop.eup %944 }
 0x2cf   : > { %911 = vmatmul.mubr.msk.f32.vlgmr.msra.gmra.mrb[4].mxu1 %vm400_vm2, %v945_v31  ;;  %v565_v32 = vsel %vm400_vm2, %v945_v31, 0.0 }
 0x2d0   : > { %566 = vadd.xlane.f32.xlu1 %v565_v32  ;;  %919 = vmatpush3.msra.mxu1 %v145_v35 }
 0x2d2   : > { %v947_v33 = vpop.eup %946 }
 0x2d3   : > { %916 = vmatmul.mubr.msk.f32.vlgmr.msra.gmra.mrb[6].mxu0 %vm400_vm2, %v947_v33  ;;  %v568_v34 = vsel %vm400_vm2, %v947_v33, 0.0 }
 0x2d4   : > { %569 = vadd.xlane.f32.xlu1 %v568_v34 }
 0x35d   : > { %v567_v36 = vpop.xlane.xlu1 %566 }
 0x35e   : > { %948 = vrcp.f32 %v567_v36 }
 0x361   : > { %v570_v37 = vpop.xlane.xlu1 %569 }
 0x362   : > { %950 = vrcp.f32 %v570_v37 }
 0x368   : > { %v949_v38 = vpop.eup %948 }
 0x36c   : > { %v951_v42 = vpop.eup %950 }
 0x3a2   : > { %v640_v39 = vpop.f32.mrb[4].mxu1 }
 0x3a3   : > { %v719_v40 = vmul.f32 %v949_v38, %v640_v39  ;;  %v912_v41 = vpop.f32.mrb[5].mxu1 }
 0x3a5   : > { %920 = vmatprep.mubr.msk.f32.mxu1 %vm400_vm2, %v719_v40 }
 0x3a6   : > { %v713_v43 = vpop.f32.mrb[6].mxu0 }
 0x3a7   : > { %v720_v44 = vmul.f32 %v951_v42, %v713_v43  ;;  %v917_v45 = vpop.f32.mrb[7].mxu0 }
 0x3a9   : > { %921 = vmatmul.mubr.msk.f32.vlgmr.msra.gmra.mrb[6].mxu1 %vm400_vm2, %v720_v44 }
 0x47a   :  { %129 = sbr.rel (!%p127_p0) target bundleno = 126 (0x7e), region = 87 }
 0x47c   : > { %v922_v48 = vpop.f32.mrb[6].mxu1 }
 0x47d   : > { %v805_v49 = vadd.f32 %v922_v48, %v803_v46  ;;  %v793_v50 = vpop.f32.mrb[7].mxu1 }
 0x47e   : > { %v804_v51 = vadd.f32 %v802_v47, %v793_v50 }
 0x47f   : > { %807 = vst.msk [vmem:[#allocation2 + $0x8] sm:$0xff] %vm122_vm0, %v805_v49 }
 0x480   : > { %806 = vst.msk [vmem:[#allocation2] sm:$0xff] %vm122_vm0, %v804_v51 }
 0x486   :  { %v809_v53 = vld [vmem:[#allocation2 + $0x8] sm:$0xff] }
 0x487   :  { %v808_v52 = vld [vmem:[#allocation2] sm:$0xff]  ;;  %811 = vst.msk [vmem:[#allocation15 + $0x8] sm:$0xff] %vm122_vm0, %v809_v53 }
 0x488   :  { %810 = vst.msk [vmem:[#allocation15] sm:$0xff] %vm122_vm0, %v808_v52 }
 0x489   :  { %1117 = shalt.err (!%p1114_p5)
}
 0x48a   :  { %s1118_s22 = scalar_lea.hbm %s1396_s7, 256 }
 0x48b   :  { %p1119_p6 = scmp.ne.s32.totalorder %s1396_s7, %s1118_s22  ;;  %p1122_p7 = scmp.lt.u32.totalorder %s1118_s22, %s1396_s7 }
 0x48d   :  { %p1124_p8 = pnand %p1122_p7, %p1119_p6 }
 0x48f   :  { %1127 = shalt.err (!%p1124_p8)
}
 0x490   :  { %823 = dma.vmem_to_hbm [thread:$0]  %s818_s18, 256, %s1396_s7, [#allocation5], %s1148_s13, %s1148_s13, %s1149_s14  }
 0x491   :  { %1140 = dma.done.wait [#allocation5], 256  }
 0x492   :  { %1141 = vsyncadd [#allocation5], 4294967040 }
 0x493   :  { %827 = vsyncpa [#allocation4], 1 }
 0x494   :  { %828 = vsyncpa [#allocation7], 1 }
 0x495   :  { %829 = vsyncpa [#allocation10], 1 }
 0x496   :  { %830 = vsyncpa [#allocation13], 1 }
 0x497   :  { %831 = vsyncpa [#allocation5], 1 }

</bundles_post_ra>
